<compile_context>
chip_gen: v6e
topology: v6e:2x2x1
jax: 0.10.0
libtpu: 0.0.40
codegen_flags: <defaults>
</compile_context>

<pallas_src>
import math
import jax
import jax.numpy as jnp
from jax.experimental import pallas as pl
from jax.experimental.pallas import tpu as pltpu


_INV_SQRT2 = 1.0 / math.sqrt(2.0)


def _gelu_exact(x):
    # PyTorch nn.GELU() default = exact (erf-based) GELU.
    return 0.5 * x * (1.0 + jax.lax.erf(x * _INV_SQRT2))


def _round_up(n, m):
    return ((n + m - 1) // m) * m


def mlp_kernel(x_ref, w1_ref, b1_ref, w2_ref, b2_ref, o_ref, acc_ref):
    # Grid: (row tiles [parallel], hidden tiles [arbitrary/reduction]).
    # x_ref : (tm, Cp)  bf16    w1_ref: (Cp, th) bf16   b1_ref: (1, th) f32
    # w2_ref: (th, Cp)  bf16    b2_ref: (1, Cp)  f32
    # o_ref : (tm, Cp)  f32     acc_ref: (tm, Cp) f32 scratch, resident over h
    h_idx = pl.program_id(1)

    @pl.when(h_idx == 0)
    def _():
        acc_ref[...] = jnp.zeros_like(acc_ref)

    # First matmul on the MXU (bf16 in, f32 accumulate) + f32 bias + exact GELU.
    h = jnp.dot(x_ref[...], w1_ref[...], preferred_element_type=jnp.float32)
    h = _gelu_exact(h + b1_ref[...])

    # Partial second matmul for this hidden tile, accumulated in f32.
    acc_ref[...] += jnp.dot(h.astype(w2_ref.dtype), w2_ref[...],
                            preferred_element_type=jnp.float32)

    @pl.when(h_idx == pl.num_programs(1) - 1)
    def _():
        # Dropout: identity at inference time.
        # TODO(synk): training-mode dropout would use pltpu.prng_seed +
        #             pltpu.prng_random_bits to build the keep mask.
        o_ref[...] = (acc_ref[...] + b2_ref[...]).astype(o_ref.dtype)


def mlp_forward(x, w1, b1, w2, b2, *, tm=256, th=512):
    """x: (B, T, C) float32; w1: (C, 4C); b1: (1, 4C); w2: (4C, C); b2: (1, C)."""
    B, T, C = x.shape
    H = w1.shape[1]
    M = B * T

    # Tile sizes: rows a multiple of 16 (bf16 sublane-safe), lane dims multiples
    # of 128 for lane-dense (unmasked) stores.
    tm_eff = min(tm, _round_up(M, 16))
    th_eff = min(th, _round_up(H, 128))
    Mp = _round_up(M, tm_eff)
    Cp = _round_up(C, 128)
    Hp = _round_up(H, th_eff)

    # Zero-pad: padded rows/cols contribute exact zeros and are sliced off.
    x2d = jnp.zeros((Mp, Cp), jnp.float32).at[:M, :C].set(x.reshape(M, C))
    w1p = jnp.zeros((Cp, Hp), jnp.float32).at[:C, :H].set(w1)
    b1p = jnp.zeros((1, Hp), jnp.float32).at[:, :H].set(b1.reshape(1, H))
    w2p = jnp.zeros((Hp, Cp), jnp.float32).at[:H, :C].set(w2)
    b2p = jnp.zeros((1, Cp), jnp.float32).at[:, :C].set(b2.reshape(1, C))

    # MXU is bf16-native: cast matmul operands; biases / accumulation stay f32.
    x_bf = x2d.astype(jnp.bfloat16)
    w1_bf = w1p.astype(jnp.bfloat16)
    w2_bf = w2p.astype(jnp.bfloat16)

    n_rows = Mp // tm_eff
    n_h = Hp // th_eff

    # Scoped-VMEM budget: double-buffered blocks + accumulator + GELU intermediate.
    est = (2 * tm_eff * Cp * 2        # x blocks (bf16)
           + 2 * Cp * th_eff * 2      # w1 blocks (bf16)
           + 2 * th_eff * 4           # b1 blocks (f32)
           + 2 * th_eff * Cp * 2      # w2 blocks (bf16)
           + 2 * Cp * 4               # b2 blocks (f32)
           + 2 * tm_eff * Cp * 4      # output blocks (f32)
           + tm_eff * Cp * 4          # accumulator scratch (f32)
           + tm_eff * th_eff * 4)     # GELU intermediate (f32)
    vmem_limit = min(max(int(est * 1.5), 32 << 20), 64 << 20)

    out = pl.pallas_call(
        mlp_kernel,
        out_shape=jax.ShapeDtypeStruct((Mp, Cp), jnp.float32),
        grid_spec=pltpu.PrefetchScalarGridSpec(
            num_scalar_prefetch=0,
            grid=(n_rows, n_h),
            in_specs=[
                pl.BlockSpec((tm_eff, Cp), lambda i, h: (i, 0)),   # x rows
                pl.BlockSpec((Cp, th_eff), lambda i, h: (0, h)),   # w1 hidden tile
                pl.BlockSpec((1, th_eff), lambda i, h: (0, h)),    # b1 hidden tile
                pl.BlockSpec((th_eff, Cp), lambda i, h: (h, 0)),   # w2 hidden tile
                pl.BlockSpec((1, Cp), lambda i, h: (0, 0)),        # b2
            ],
            out_specs=pl.BlockSpec((tm_eff, Cp), lambda i, h: (i, 0)),
            scratch_shapes=[pltpu.VMEM((tm_eff, Cp), jnp.float32)],
        ),
        compiler_params=pltpu.CompilerParams(
            dimension_semantics=("parallel", "arbitrary"),
            vmem_limit_bytes=vmem_limit),
    )(x_bf, w1_bf, b1p, w2_bf, b2p)

    return out[:M, :C].reshape(B, T, C)


if __name__ == "__main__":
    # Small config consistent with the module: n_embd=32, bias=True, dropout=0.
    B, T, C = 2, 8, 32
    H = 4 * C

    key = jax.random.PRNGKey(0)
    kx, k1, k2, k3, k4 = jax.random.split(key, 5)

    x = jax.random.normal(kx, (B, T, C), dtype=jnp.float32)
    # Deterministic parameter init (roughly PyTorch Linear scale).
    w1 = jax.random.normal(k1, (C, H), dtype=jnp.float32) * (1.0 / math.sqrt(C))
    b1 = jax.random.normal(k2, (1, H), dtype=jnp.float32) * 0.01
    w2 = jax.random.normal(k3, (H, C), dtype=jnp.float32) * (1.0 / math.sqrt(H))
    b2 = jax.random.normal(k4, (1, C), dtype=jnp.float32) * 0.01

    y = mlp_forward(x, w1, b1, w2, b2)
    y = jax.block_until_ready(y)
    assert y.shape == (B, T, C)

    # Reference matching the kernel numerics (bf16 MXU operands, f32 accumulate).
    def ref_bf16(xf, w1f, b1f, w2f, b2f):
        xb = xf.astype(jnp.bfloat16).astype(jnp.float32).reshape(-1, C)
        w1b = w1f.astype(jnp.bfloat16).astype(jnp.float32)
        w2b = w2f.astype(jnp.bfloat16).astype(jnp.float32)
        h = _gelu_exact(jnp.dot(xb, w1b) + b1f)
        h = h.astype(jnp.bfloat16).astype(jnp.float32)
        return (jnp.dot(h, w2b) + b2f).reshape(B, T, C)

    y_ref = ref_bf16(x, w1, b1, w2, b2)
    assert jnp.allclose(y, y_ref, atol=2e-2, rtol=2e-2), "mismatch vs bf16 reference"

    # Loose sanity check vs the pure-f32 PyTorch-equivalent math.
    h32 = _gelu_exact(jnp.dot(x.reshape(-1, C), w1) + b1)
    y32 = (jnp.dot(h32, w2) + b2).reshape(B, T, C)
    assert jnp.allclose(y, y32, atol=1e-1, rtol=1e-1), "mismatch vs f32 reference"

    print("KERNEL_OK")
</pallas_src>

<mosaic_0001>
module attributes {stable_mosaic.version = 11 : i64} {
  func.func @mlp_kernel(%arg0: i32, %arg1: i32, %arg2: memref<16x128xbf16, #tpu.memory_space<vmem>>, %arg3: memref<128x128xbf16, #tpu.memory_space<vmem>>, %arg4: memref<1x128xf32, #tpu.memory_space<vmem>>, %arg5: memref<128x128xbf16, #tpu.memory_space<vmem>>, %arg6: memref<1x128xf32, #tpu.memory_space<vmem>>, %arg7: memref<16x128xf32, #tpu.memory_space<vmem>>, %arg8: memref<16x128xf32, #tpu.memory_space<vmem>>) attributes {dimension_semantics = [#tpu.dimension_semantics<parallel>, #tpu.dimension_semantics<arbitrary>], iteration_bounds = array<i64: 1, 1>, scalar_prefetch = 0 : i64, scratch_operands = 1 : i64, tpu.core_type = #tpu.core_type<tc>, window_params = [{transform_indices = @transform_0, window_bounds = array<i64: 16, 128>}, {transform_indices = @transform_1, window_bounds = array<i64: 128, 128>}, {transform_indices = @transform_2, window_bounds = array<i64: 1, 128>}, {transform_indices = @transform_3, window_bounds = array<i64: 128, 128>}, {pipeline_mode = #tpu.pipeline_mode<synchronous>, transform_indices = @transform_4, window_bounds = array<i64: 1, 128>}, {transform_indices = @transform_5, window_bounds = array<i64: 16, 128>}]} {
    %c0_i32 = arith.constant 0 : i32
    %0 = arith.cmpi eq, %arg1, %c0_i32 : i32
    %1 = arith.extui %0 : i1 to i32
    %c0_i32_0 = arith.constant 0 : i32
    %2 = arith.cmpi ne, %1, %c0_i32_0 : i32
    scf.if %2 {
      %cst_18 = arith.constant 0.000000e+00 : f32
      %26 = vector.broadcast %cst_18 : f32 to vector<16x128xf32>
      %c0_19 = arith.constant 0 : index
      %c0_20 = arith.constant 0 : index
      %27 = vector.load %arg8[%c0_19, %c0_20] : memref<16x128xf32, #tpu.memory_space<vmem>>, vector<16x128xf32>
      tpu.vector_store %arg8[%c0_19, %c0_20], %26 {strides = array<i32>} : memref<16x128xf32, #tpu.memory_space<vmem>>, vector<16x128xf32>,
    } else {
    }
    %c0 = arith.constant 0 : index
    %c0_1 = arith.constant 0 : index
    %3 = vector.load %arg2[%c0, %c0_1] : memref<16x128xbf16, #tpu.memory_space<vmem>>, vector<16x128xbf16>
    %c0_2 = arith.constant 0 : index
    %c0_3 = arith.constant 0 : index
    %4 = vector.load %arg3[%c0_2, %c0_3] : memref<128x128xbf16, #tpu.memory_space<vmem>>, vector<128x128xbf16>
    %cst = arith.constant dense<0.000000e+00> : vector<16x128xf32>
    %5 = tpu.matmul %3, %4, %cst {dimension_numbers = #tpu.dot_dimension_numbers<[1], [0], [0], [1], [0, 0, 1, 1], [], []>} : vector<16x128xbf16>, vector<128x128xbf16>, vector<16x128xf32> -> vector<16x128xf32>
    %c0_4 = arith.constant 0 : index
    %c0_5 = arith.constant 0 : index
    %6 = vector.load %arg4[%c0_4, %c0_5] : memref<1x128xf32, #tpu.memory_space<vmem>>, vector<1x128xf32>
    %7 = vector.broadcast %6 : vector<1x128xf32> to vector<16x128xf32>
    %8 = arith.addf %5, %7 : vector<16x128xf32>
    %cst_6 = arith.constant 5.000000e-01 : f32
    %9 = vector.broadcast %cst_6 : f32 to vector<16x128xf32>
    %10 = arith.mulf %9, %8 : vector<16x128xf32>
    %cst_7 = arith.constant 0.707106769 : f32
    %11 = vector.broadcast %cst_7 : f32 to vector<16x128xf32>
    %12 = arith.mulf %8, %11 : vector<16x128xf32>
    %13 = math.erf %12 : vector<16x128xf32>
    %cst_8 = arith.constant 1.000000e+00 : f32
    %14 = vector.broadcast %cst_8 : f32 to vector<16x128xf32>
    %15 = arith.addf %14, %13 : vector<16x128xf32>
    %16 = arith.mulf %10, %15 : vector<16x128xf32>
    %c0_9 = arith.constant 0 : index
    %c0_10 = arith.constant 0 : index
    %17 = vector.load %arg8[%c0_9, %c0_10] : memref<16x128xf32, #tpu.memory_space<vmem>>, vector<16x128xf32>
    %18 = arith.truncf %16 : vector<16x128xf32> to vector<16x128xbf16>
    %c0_11 = arith.constant 0 : index
    %c0_12 = arith.constant 0 : index
    %19 = vector.load %arg5[%c0_11, %c0_12] : memref<128x128xbf16, #tpu.memory_space<vmem>>, vector<128x128xbf16>
    %cst_13 = arith.constant dense<0.000000e+00> : vector<16x128xf32>
    %20 = tpu.matmul %18, %19, %cst_13 {dimension_numbers = #tpu.dot_dimension_numbers<[1], [0], [0], [1], [0, 0, 1, 1], [], []>} : vector<16x128xbf16>, vector<128x128xbf16>, vector<16x128xf32> -> vector<16x128xf32>
    %21 = arith.addf %17, %20 : vector<16x128xf32>
    %c0_14 = arith.constant 0 : index
    %c0_15 = arith.constant 0 : index
    %22 = vector.load %arg8[%c0_14, %c0_15] : memref<16x128xf32, #tpu.memory_space<vmem>>, vector<16x128xf32>
    tpu.vector_store %arg8[%c0_14, %c0_15], %21 {strides = array<i32>} : memref<16x128xf32, #tpu.memory_space<vmem>>, vector<16x128xf32>,
    %c0_i32_16 = arith.constant 0 : i32
    %23 = arith.cmpi eq, %arg1, %c0_i32_16 : i32
    %24 = arith.extui %23 : i1 to i32
    %c0_i32_17 = arith.constant 0 : i32
    %25 = arith.cmpi ne, %24, %c0_i32_17 : i32
    scf.if %25 {
      %c0_18 = arith.constant 0 : index
      %c0_19 = arith.constant 0 : index
      %26 = vector.load %arg8[%c0_18, %c0_19] : memref<16x128xf32, #tpu.memory_space<vmem>>, vector<16x128xf32>
      %c0_20 = arith.constant 0 : index
      %c0_21 = arith.constant 0 : index
      %27 = vector.load %arg6[%c0_20, %c0_21] : memref<1x128xf32, #tpu.memory_space<vmem>>, vector<1x128xf32>
      %28 = vector.broadcast %27 : vector<1x128xf32> to vector<16x128xf32>
      %29 = arith.addf %26, %28 : vector<16x128xf32>
      %c0_22 = arith.constant 0 : index
      %c0_23 = arith.constant 0 : index
      %30 = vector.load %arg7[%c0_22, %c0_23] : memref<16x128xf32, #tpu.memory_space<vmem>>, vector<16x128xf32>
      tpu.vector_store %arg7[%c0_22, %c0_23], %29 {strides = array<i32>} : memref<16x128xf32, #tpu.memory_space<vmem>>, vector<16x128xf32>,
    } else {
    }
    return
  }
  func.func @transform_0(%arg0: i32, %arg1: i32) -> (i32, i32) {
    %c0_i32 = arith.constant 0 : i32
    %c0_i32_0 = arith.constant 0 : i32
    return %arg0, %c0_i32 : i32, i32
  }
  func.func @transform_1(%arg0: i32, %arg1: i32) -> (i32, i32) {
    %c0_i32 = arith.constant 0 : i32
    %c0_i32_0 = arith.constant 0 : i32
    return %c0_i32, %arg1 : i32, i32
  }
  func.func @transform_2(%arg0: i32, %arg1: i32) -> (i32, i32) {
    %c0_i32 = arith.constant 0 : i32
    %c0_i32_0 = arith.constant 0 : i32
    return %c0_i32, %arg1 : i32, i32
  }
  func.func @transform_3(%arg0: i32, %arg1: i32) -> (i32, i32) {
    %c0_i32 = arith.constant 0 : i32
    %c0_i32_0 = arith.constant 0 : i32
    return %arg1, %c0_i32 : i32, i32
  }
  func.func @transform_4(%arg0: i32, %arg1: i32) -> (i32, i32) {
    %c0_i32 = arith.constant 0 : i32
    %c0_i32_0 = arith.constant 0 : i32
    %c0_i32_1 = arith.constant 0 : i32
    return %c0_i32, %c0_i32_0 : i32, i32
  }
  func.func @transform_5(%arg0: i32, %arg1: i32) -> (i32, i32) {
    %c0_i32 = arith.constant 0 : i32
    %c0_i32_0 = arith.constant 0 : i32
    return %arg0, %c0_i32 : i32, i32
  }
}

</mosaic_0001>

<bundles_post_ra>
// kernel: tpu_custom_call.1
= control target key start
LH: loop header
LB: loop body
LE: loop exit
PB: predicated region body
PF: predicated region fallthrough
CT: control target
= control target key end

     0   :  { %10 = vsyncpa [#allocation4], 0  ;;  %s597_s0 = inlined_call_operand.hbm [shape: bf16[16,128], index: 0, kind: input, shape index: {}]   ;;  %s598_s1 = inlined_call_operand.hbm [shape: bf16[128,128], index: 1, kind: input, shape index: {}]   ;;  %s599_s2 = inlined_call_operand.vmem [shape: f32[1,128], index: 2, kind: input, shape index: {}]   ;;  %s600_s3 = inlined_call_operand.hbm [shape: bf16[128,128], index: 3, kind: input, shape index: {}]   ;;  %s601_s4 = inlined_call_operand.vmem [shape: f32[1,128], index: 4, kind: input, shape index: {}]   ;;  %s602_s5 = inlined_call_operand.hbm [shape: f32[16,128], index: 5, kind: output, shape index: {}]  }
   0x1   :  { %11 = vsyncpa [#allocation7], 0 }
   0x2   :  { %12 = vsyncpa [#allocation5], 0  ;;  %s539_s18 = smov [#allocation6]   ;;  %s540_s20 = smov [#allocation3]  }
   0x3   :  { %s30_s19 = sshll.u32 %s539_s18, 4  ;;  %s18_s21 = sshll.u32 %s540_s20, 4  ;;  %s31_s19 = int_to_ptr.vmem [resolvable:$true] %s30_s19  ;;  %s19_s21 = int_to_ptr.vmem [resolvable:$true] %s18_s21 }
   0x4   :  { %s461_s22 = scalar_lea.vmem %s31_s19, 1024  ;;  %p466_p1 = scmp.lt.s32.totalorder %s31_s19, %s31_s19 }
   0x5   :  { %p462_p0 = scmp.ne.s32.totalorder %s31_s19, %s461_s22  ;;  %p467_p2 = scmp.lt.s32.totalorder %s461_s22, %s461_s22 }
   0x7   :  { %p468_p3 = por %p467_p2, %p466_p1 }
   0x9   :  { %p469_p4 = pnand %p468_p3, %p462_p0 }
   0xb   :  { %472 = shalt.err (!%p469_p4)
}
   0xc   :  { %s541_s23 = smov 64   ;;  %s542_s24 = smov 4  }
   0xd   :  { %36 = dma.hbm_to_vmem [thread:$0]  %s598_s1, 1024, %s31_s19, [#allocation7], %s541_s23, %s541_s23, %s542_s24  }
   0xe   :  { %s481_s27 = scalar_lea.vmem %s19_s21, 128  ;;  %p486_p6 = scmp.lt.s32.totalorder %s19_s21, %s19_s21 }
   0xf   :  { %p482_p5 = scmp.ne.s32.totalorder %s19_s21, %s481_s27  ;;  %p487_p7 = scmp.lt.s32.totalorder %s481_s27, %s481_s27 }
  0x11   :  { %p488_p8 = por %p487_p7, %p486_p6 }
  0x13   :  { %p489_p9 = pnand %p488_p8, %p482_p5 }
  0x15   :  { %492 = shalt.err (!%p489_p9)
}
  0x16   :  { %24 = dma.hbm_to_vmem [thread:$0]  %s597_s0, 128, %s19_s21, [#allocation4], %s541_s23, %s541_s23, %s542_s24  }
  0x17   :  { %s543_s30 = smov [#allocation8]  }
  0x18   :  { %s44_s6 = sshll.u32 %s543_s30, 4  ;;  %s45_s6 = int_to_ptr.vmem [resolvable:$true] %s44_s6 }
  0x19   :  { %s501_s7 = scalar_lea.vmem %s45_s6, 1024  ;;  %p506_p11 = scmp.lt.s32.totalorder %s45_s6, %s45_s6 }
  0x1a   :  { %p502_p10 = scmp.ne.s32.totalorder %s45_s6, %s501_s7  ;;  %p507_p12 = scmp.lt.s32.totalorder %s501_s7, %s501_s7 }
  0x1c   :  { %p508_p13 = por %p507_p12, %p506_p11 }
  0x1e   :  { %p509_p0 = pnand %p508_p13, %p502_p10 }
  0x20   :  { %512 = shalt.err (!%p509_p0)
}
  0x21   :  { %50 = dma.hbm_to_vmem [thread:$0]  %s600_s3, 1024, %s45_s6, [#allocation7], %s541_s23, %s541_s23, %s542_s24  }
  0x22   :  { %533 = dma.done.wait [#allocation4], 128  }
  0x23   :  { %534 = vsyncadd [#allocation4], 4294967168 }
  0x24   :  { %535 = dma.done.wait [#allocation7], 2048  }
  0x25   :  { %536 = vsyncadd [#allocation7], 4294965248  ;;  %v544_v0 = vmov 0.0   ;;  %vm545_vm0 = vmmov 0   ;;  %v432_v1 = vld [vmem:[#allocation6 + $0x38] sm:$0xff]   ;;  %v433_v2 = vld [vmem:[#allocation6 + $0x30] sm:$0xff]  }
  0x26   :  { %382 = vmatprep.subr.bf16.mxu0 %v544_v0  ;;  %398 = vmatprep.mubr.msk.bf16.mxu0 %vm545_vm0, %v544_v0  ;;  %v434_v3 = vld [vmem:[#allocation6 + $0x28] sm:$0xff]   ;;  %v441_v4 = vld [vmem:[#allocation8 + $0x38] sm:$0xff]   ;;  %v435_v5 = vld [vmem:[#allocation6 + $0x20] sm:$0xff]   ;;  %s546_s10 = smov [#allocation9]  }
  0x27   :  { %402 = vmatprep.subr.bf16.mxu1 %v544_v0  ;;  %418 = vmatprep.mubr.msk.bf16.mxu1 %vm545_vm0, %v544_v0  ;;  %v436_v6 = vld [vmem:[#allocation6 + $0x18] sm:$0xff]   ;;  %v437_v7 = vld [vmem:[#allocation6 + $0x10] sm:$0xff]   ;;  %v438_v8 = vld [vmem:[#allocation6 + $0x8] sm:$0xff]   ;;  %s332_s11 = sshll.u32 %s546_s10, 4  ;;  %s333_s11 = int_to_ptr.vmem [resolvable:$true] %s332_s11 }
  0x28   :  { %383 = vmatpush3.bf16.msra.mxu0 %v432_v1  ;;  %403 = vmatpush3.bf16.msra.mxu1 %v441_v4  ;;  %v439_v9 = vld [vmem:[#allocation6] sm:$0xff]   ;;  %v440_v10 = vld [vmem:[#allocation3] sm:$0xff]   ;;  %v442_v11 = vld [vmem:[#allocation8 + $0x30] sm:$0xff]   ;;  %s513_s12 = scalar_lea.vmem %s333_s11, 256  ;;  %p518_p2 = scmp.lt.s32.totalorder %s333_s11, %s333_s11 }
  0x29   :  { %384 = vmatprep.subr.bf16.mxu0 %v544_v0  ;;  %404 = vmatprep.subr.bf16.mxu1 %v544_v0  ;;  %v443_v12 = vld [vmem:[#allocation8 + $0x28] sm:$0xff]   ;;  %v444_v13 = vld [vmem:[#allocation8 + $0x20] sm:$0xff]   ;;  %v445_v14 = vld [vmem:[#allocation8 + $0x18] sm:$0xff]   ;;  %p514_p1 = scmp.ne.s32.totalorder %s333_s11, %s513_s12  ;;  %p519_p3 = scmp.lt.s32.totalorder %s513_s12, %s513_s12 }
  0x2a   :  { %v446_v15 = vld [vmem:[#allocation8 + $0x10] sm:$0xff]   ;;  %v447_v16 = vld [vmem:[#allocation8 + $0x8] sm:$0xff]   ;;  %v448_v17 = vld [vmem:[#allocation8] sm:$0xff]  }
  0x2b   :  { %v345_v18 = vld [vmem:[%s599_s2] ss:$0 sm:$0xff]  ;;  %p520_p4 = por %p519_p3, %p518_p2 }
  0x2c   :  { %385 = vmatpush3.bf16.msra.mxu0 %v433_v2  ;;  %405 = vmatpush3.bf16.msra.mxu1 %v442_v11  ;;  %v363_v36 = vld [vmem:[%s601_s4] ss:$0 sm:$0xff] }
  0x2d   :  { %386 = vmatprep.subr.bf16.mxu0 %v544_v0  ;;  %406 = vmatprep.subr.bf16.mxu1 %v544_v0  ;;  %p521_p5 = pnand %p520_p4, %p514_p1 }
  0x30   :  { %387 = vmatpush3.bf16.msra.mxu0 %v434_v3  ;;  %407 = vmatpush3.bf16.msra.mxu1 %v443_v12 }
  0x31   :  { %388 = vmatprep.subr.bf16.mxu0 %v544_v0  ;;  %408 = vmatprep.subr.bf16.mxu1 %v544_v0 }
  0x34   :  { %389 = vmatpush3.bf16.msra.mxu0 %v435_v5  ;;  %409 = vmatpush3.bf16.msra.mxu1 %v444_v13 }
  0x35   :  { %390 = vmatprep.subr.bf16.mxu0 %v544_v0  ;;  %410 = vmatprep.subr.bf16.mxu1 %v544_v0 }
  0x38   :  { %391 = vmatpush3.bf16.msra.mxu0 %v436_v6  ;;  %411 = vmatpush3.bf16.msra.mxu1 %v445_v14 }
  0x39   :  { %392 = vmatprep.subr.bf16.mxu0 %v544_v0  ;;  %412 = vmatprep.subr.bf16.mxu1 %v544_v0 }
  0x3c   :  { %393 = vmatpush3.bf16.msra.mxu0 %v437_v7  ;;  %413 = vmatpush3.bf16.msra.mxu1 %v446_v15 }
  0x3d   :  { %394 = vmatprep.subr.bf16.mxu0 %v544_v0  ;;  %414 = vmatprep.subr.bf16.mxu1 %v544_v0 }
  0x40   :  { %395 = vmatpush3.bf16.msra.mxu0 %v438_v8  ;;  %415 = vmatpush3.bf16.msra.mxu1 %v447_v16 }
  0x41   :  { %396 = vmatprep.subr.bf16.mxu0 %v544_v0  ;;  %416 = vmatprep.subr.bf16.mxu1 %v544_v0 }
  0x44   :  { %397 = vmatpush3.bf16.msra.mxu0 %v439_v9  ;;  %417 = vmatpush3.bf16.msra.mxu1 %v448_v17 }
  0x47   :  { %399 = vmatmul.mubr.bf16.vlgmr.msra.gmra.mxu0 %v440_v10 }
 0x107   :  { %v182_v19 = vpop.f32.mrf.mxu0 }
 0x108   :  { %v183_v20 = vadd.f32 %v345_v18, %v182_v19 }
 0x109   :  { %v400_v21 = vpop.f32.mrf.mxu0 }
 0x10a   :  { %v191_v22 = vmul.f32 0.70710677, %v183_v20  ;;  %v189_v30 = vmul.f32 0.5, %v183_v20 }
 0x10b   :  { %v185_v23 = vpop.f32.mrf.mxu0 }
 0x10c   :  { %449 = verf.f32 %v191_v22  ;;  %v186_v24 = vadd.f32 %v345_v18, %v185_v23 }
 0x10d   :  { %v401_v25 = vpop.f32.mrf.mxu0 }
 0x10e   :  { %v192_v26 = vmul.f32 0.70710677, %v186_v24  ;;  %v190_v31 = vmul.f32 0.5, %v186_v24 }
 0x110   :  { %451 = verf.f32 %v192_v26 }
 0x119   :  { %v450_v27 = vpop.eup %449 }
 0x11a   :  { %v195_v28 = vadd.f32 1.0, %v450_v27 }
 0x11c   :  { %v197_v33 = vmul.f32 %v195_v28, %v189_v30 }
 0x11d   :  { %v452_v29 = vpop.eup %451 }
 0x11e   :  { %v196_v32 = vadd.f32 1.0, %v452_v29 }
 0x120   :  { %v198_v34 = vmul.f32 %v196_v32, %v190_v31 }
 0x122   :  { %v201_v35 = vpack.c.bf16 %v198_v34, %v197_v33 }
 0x124   :  { %419 = vmatmul.mubr.bf16.vlgmr.msra.gmra.mxu1 %v201_v35 }
 0x1e4   :  { %v300_v37 = vpop.f32.mrf.mxu1 }
 0x1e5   :  { %v323_v38 = vadd.f32 %v363_v36, %v300_v37 }
 0x1e6   :  { %v420_v39 = vpop.f32.mrf.mxu1 }
 0x1e7   :  { %325 = vst [vmem:[#allocation9] sm:$0xff] %v323_v38 }
 0x1e8   :  { %v303_v40 = vpop.f32.mrf.mxu1 }
 0x1e9   :  { %v324_v41 = vadd.f32 %v363_v36, %v303_v40 }
 0x1ea   :  { %v421_v42 = vpop.f32.mrf.mxu1 }
 0x1eb   :  { %326 = vst [vmem:[#allocation9 + $0x8] sm:$0xff] %v324_v41 }
 0x1ec   :  { %524 = shalt.err (!%p521_p5)
}
 0x1ed   :  { %s547_s13 = smov 128   ;;  %s548_s4 = smov 8  }
 0x1ee   :  { %338 = dma.vmem_to_hbm [thread:$0]  %s333_s11, 256, %s602_s5, [#allocation5], %s547_s13, %s547_s13, %s548_s4  }
 0x1ef   :  { %537 = dma.done.wait [#allocation5], 256  }
 0x1f0   :  { %538 = vsyncadd [#allocation5], 4294967040 }
 0x1f1   :  { %342 = vsyncpa [#allocation4], 1 }
 0x1f2   :  { %343 = vsyncpa [#allocation7], 1 }
 0x1f3   :  { %344 = vsyncpa [#allocation5], 1 }

</bundles_post_ra>
